<compile_context>
chip_gen: v6e
topology: v6e:2x2x1
jax: 0.10.0
libtpu: 0.0.40
codegen_flags: <defaults>
</compile_context>

<pallas_src>
import functools

import jax
import jax.numpy as jnp
from jax import lax
from jax.experimental import pallas as pl
from jax.experimental.pallas import tpu as pltpu


REPARAM_NOISE = 1e-6
_LARGE_B_NARROW_HEAD = 1024   # above this many (padded) rows, skip 128-lane head padding


def _round_up(x, m):
    return (x + m - 1) // m * m


def _pick_batch_tile(batch):
    """Batch-tile heuristic per perf review.

    B <= 64  : one tile (serial dependency chain dominates; splitting is overhead).
    B  > 64  : >= 2 grid steps so dimension_semantics=("parallel",) can shard
               across v7x's two TensorCores; tile capped at 512 rows.
    """
    if batch <= 64:
        return _round_up(batch, 8)
    return min(512, _round_up((batch + 1) // 2, 8))


def actor_forward_kernel(n_actions,
                         x_ref,
                         w1_ref, b1_ref,
                         w2_ref, b2_ref,
                         wh_ref, bh_ref,
                         out_ref):
    # bf16 operands on the MXU, f32 accumulation + f32 elementwise epilogue.
    x = x_ref[...].astype(jnp.bfloat16)

    # fc1 + relu
    h1 = jnp.dot(x, w1_ref[...], preferred_element_type=jnp.float32) + b1_ref[...]
    h1 = jnp.maximum(h1, 0.0).astype(jnp.bfloat16)

    # fc2 + relu
    h2 = jnp.dot(h1, w2_ref[...], preferred_element_type=jnp.float32) + b2_ref[...]
    h2 = jnp.maximum(h2, 0.0).astype(jnp.bfloat16)

    # fused (and lane-padded) mu||sigma head: one matmul, one lane-dense slab.
    head = jnp.dot(h2, wh_ref[...], preferred_element_type=jnp.float32) + bh_ref[...]

    # columns [0, n) -> mu (unclamped); columns [n, ...) -> sigma / zero padding
    # (padding columns are sliced off in the wrapper, clamping them is harmless).
    col = lax.broadcasted_iota(jnp.int32, head.shape, 1)
    clamped = jnp.clip(head, REPARAM_NOISE, 1.0)
    out_ref[...] = jnp.where(col < n_actions, head, clamped).astype(out_ref.dtype)


def actor_forward(state, fused_params, n_actions):
    """Fused ActorNetwork forward.

    state: [B, D_in] float32.
    fused_params: (W1_bf16, b1_f32, W2_bf16, b2_f32, Whead_bf16, bhead_f32)
      where Whead/bhead are [Wmu || Wsig || 0-pad] with 128-lane padding.
    Returns (mu [B, n_actions], sigma [B, n_actions]) in float32.
    """
    w1, b1, w2, b2, wh, bh = fused_params
    B, d_in = state.shape
    fc1 = w1.shape[1]
    fc2 = w2.shape[1]
    two_n = 2 * n_actions

    # Batch tiling (sublane-aligned, >= 2 steps when B > 64, cap 512 rows).
    tb = _pick_batch_tile(B)
    b_pad = _round_up(B, tb)
    nb = b_pad // tb
    if b_pad != B:
        state = jnp.pad(state, ((0, b_pad - B), (0, 0)))

    # Lane-padded (128-wide) head gives unmasked full-lane stores at small /
    # moderate B; at large B fall back to the narrow (tb, 2n) output to avoid
    # the ~32x HBM writeback inflation.
    if b_pad > _LARGE_B_NARROW_HEAD and wh.shape[1] > two_n:
        wh = wh[:, :two_n]
        bh = bh[:, :two_n]
    head_cols = wh.shape[1]

    flops = 2 * b_pad * (d_in * fc1 + fc1 * fc2 + fc2 * head_cols)
    bytes_accessed = (
        state.size * state.dtype.itemsize
        + sum(int(a.size) * a.dtype.itemsize for a in (w1, b1, w2, b2, wh, bh))
        + b_pad * head_cols * 4
    )

    kernel = functools.partial(actor_forward_kernel, n_actions)

    def build_and_run(single_buffer_weights):
        def wspec(shape):
            # Constant-index weights/biases: DMA'd once, never revisited.
            if single_buffer_weights:
                return pl.BlockSpec(shape, lambda i: (0, 0),
                                    pipeline_mode=pl.Buffered(1))
            return pl.BlockSpec(shape, lambda i: (0, 0))

        return pl.pallas_call(
            kernel,
            out_shape=jax.ShapeDtypeStruct((b_pad, head_cols), jnp.float32),
            grid_spec=pltpu.PrefetchScalarGridSpec(
                num_scalar_prefetch=0,
                grid=(nb,),
                in_specs=[
                    pl.BlockSpec((tb, d_in), lambda i: (i, 0)),   # state tile
                    wspec((d_in, fc1)),                           # W1
                    wspec((1, fc1)),                              # b1
                    wspec((fc1, fc2)),                            # W2
                    wspec((1, fc2)),                              # b2
                    wspec((fc2, head_cols)),                      # W_head = [Wmu||Wsig||0]
                    wspec((1, head_cols)),                        # b_head
                ],
                out_specs=pl.BlockSpec((tb, head_cols), lambda i: (i, 0)),
            ),
            compiler_params=pltpu.CompilerParams(
                dimension_semantics=("parallel",),      # megacore / 2-TC sharding on v7x
                vmem_limit_bytes=32 * 1024 * 1024,      # usage is ~1-2 MiB at tb=512
            ),
            cost_estimate=pl.CostEstimate(
                flops=flops, transcendentals=0, bytes_accessed=bytes_accessed),
        )(state, w1, b1, w2, b2, wh, bh)

    try:
        out = build_and_run(True)
    except Exception:
        # Some Pallas builds reject single-buffered pipeline_mode on a top-level
        # pallas_call BlockSpec; double-buffering the small constant weights is
        # the safe (and nearly equivalent) fallback.
        out = build_and_run(False)

    mu = out[:B, :n_actions]
    sigma = out[:B, n_actions:two_n]
    return mu, sigma


def init_params(key, input_dims, fc1_dims, fc2_dims, n_actions):
    """PyTorch-Linear-style init (uniform +-1/sqrt(fan_in)). Weights as [in, out], f32."""
    def linear(key, fan_in, fan_out):
        kw, kb = jax.random.split(key)
        bound = 1.0 / jnp.sqrt(fan_in)
        w = jax.random.uniform(kw, (fan_in, fan_out), jnp.float32, -bound, bound)
        b = jax.random.uniform(kb, (1, fan_out), jnp.float32, -bound, bound)
        return w, b

    k1, k2, k3, k4 = jax.random.split(key, 4)
    w1, b1 = linear(k1, input_dims, fc1_dims)
    w2, b2 = linear(k2, fc1_dims, fc2_dims)
    wmu, bmu = linear(k3, fc2_dims, n_actions)
    wsig, bsig = linear(k4, fc2_dims, n_actions)
    return (w1, b1, w2, b2, wmu, bmu, wsig, bsig)


def prepare_actor_params(params):
    """One-time prep: fuse mu/sigma heads, zero-pad to 128 output lanes, cast
    weights to bf16 (biases stay f32)."""
    w1, b1, w2, b2, wmu, bmu, wsig, bsig = params
    n = wmu.shape[1]
    two_n = 2 * n
    head_cols = max(128, _round_up(two_n, 128))

    wh = jnp.zeros((wmu.shape[0], head_cols), jnp.float32)
    wh = wh.at[:, :n].set(wmu).at[:, n:two_n].set(wsig)
    bh = jnp.zeros((1, head_cols), jnp.float32)
    bh = bh.at[:, :n].set(bmu).at[:, n:two_n].set(bsig)

    return (w1.astype(jnp.bfloat16), b1,
            w2.astype(jnp.bfloat16), b2,
            wh.astype(jnp.bfloat16), bh)


def reference_forward_bf16(state, fused_params, n_actions):
    """Pure-JAX mirror of the kernel's bf16/f32 mixed-precision path."""
    w1, b1, w2, b2, wh, bh = fused_params
    x = state.astype(jnp.bfloat16)
    h1 = jnp.maximum(jnp.dot(x, w1, preferred_element_type=jnp.float32) + b1, 0.0)
    h1 = h1.astype(jnp.bfloat16)
    h2 = jnp.maximum(jnp.dot(h1, w2, preferred_element_type=jnp.float32) + b2, 0.0)
    h2 = h2.astype(jnp.bfloat16)
    head = jnp.dot(h2, wh, preferred_element_type=jnp.float32) + bh
    mu = head[:, :n_actions]
    sigma = jnp.clip(head[:, n_actions:2 * n_actions], REPARAM_NOISE, 1.0)
    return mu, sigma


def reference_forward_f32(state, params):
    """Full-f32 reference matching the original PyTorch module."""
    w1, b1, w2, b2, wmu, bmu, wsig, bsig = params
    h1 = jnp.maximum(state @ w1 + b1, 0.0)
    h2 = jnp.maximum(h1 @ w2 + b2, 0.0)
    mu = h2 @ wmu + bmu
    sigma = jnp.clip(h2 @ wsig + bsig, REPARAM_NOISE, 1.0)
    return mu, sigma


if __name__ == "__main__":
    # Shapes consistent with the module: input_dims=(16,), fc1=fc2=256, n_actions=2.
    D_IN, FC1, FC2, N_ACT = 16, 256, 256, 2

    key = jax.random.PRNGKey(0)
    k_params, k_state_a, k_state_b = jax.random.split(key, 3)
    params = init_params(k_params, D_IN, FC1, FC2, N_ACT)
    fused_params = prepare_actor_params(params)

    for batch, k_state in ((8, k_state_a), (200, k_state_b)):
        state = jax.random.normal(k_state, (batch, D_IN), dtype=jnp.float32)

        mu, sigma = actor_forward(state, fused_params, N_ACT)
        jax.block_until_ready((mu, sigma))

        assert mu.shape == (batch, N_ACT) and sigma.shape == (batch, N_ACT)

        # Exact-ish check against a pure-JAX mirror of the kernel's precision path.
        mu_ref, sigma_ref = reference_forward_bf16(state, fused_params, N_ACT)
        assert jnp.allclose(mu, mu_ref, atol=1e-3, rtol=1e-3)
        assert jnp.allclose(sigma, sigma_ref, atol=1e-3, rtol=1e-3)

        # Loose sanity check against the full-f32 PyTorch-equivalent forward.
        # (bf16 weights are an intentional precision trade-off; biases and all
        # accumulation stay f32.)
        mu_f32, sigma_f32 = reference_forward_f32(state, params)
        assert jnp.allclose(mu, mu_f32, atol=1e-1, rtol=1e-1)
        assert jnp.allclose(sigma, sigma_f32, atol=1e-1, rtol=1e-1)

    # TODO(synk): sample_normal (Normal rsample, tanh squash, log-prob correction)
    # is stochastic policy sampling, not part of forward(); left outside the kernel.

    print("KERNEL_OK")
</pallas_src>

<mosaic_0001>
module attributes {stable_mosaic.version = 11 : i64} {
  func.func @actor_forward_kernel(%arg0: i32, %arg1: memref<8x16xf32, #tpu.memory_space<vmem>>, %arg2: memref<16x256xbf16, #tpu.memory_space<vmem>>, %arg3: memref<1x256xf32, #tpu.memory_space<vmem>>, %arg4: memref<256x256xbf16, #tpu.memory_space<vmem>>, %arg5: memref<1x256xf32, #tpu.memory_space<vmem>>, %arg6: memref<256x128xbf16, #tpu.memory_space<vmem>>, %arg7: memref<1x128xf32, #tpu.memory_space<vmem>>, %arg8: memref<8x128xf32, #tpu.memory_space<vmem>>) attributes {dimension_semantics = [#tpu.dimension_semantics<parallel>], iteration_bounds = array<i64: 1>, scalar_prefetch = 0 : i64, scratch_operands = 0 : i64, tpu.core_type = #tpu.core_type<tc>, window_params = [{transform_indices = @transform_0, window_bounds = array<i64: 8, 16>}, {pipeline_mode = #tpu.pipeline_mode<synchronous>, transform_indices = @transform_1, window_bounds = array<i64: 16, 256>}, {pipeline_mode = #tpu.pipeline_mode<synchronous>, transform_indices = @transform_2, window_bounds = array<i64: 1, 256>}, {pipeline_mode = #tpu.pipeline_mode<synchronous>, transform_indices = @transform_3, window_bounds = array<i64: 256, 256>}, {pipeline_mode = #tpu.pipeline_mode<synchronous>, transform_indices = @transform_4, window_bounds = array<i64: 1, 256>}, {pipeline_mode = #tpu.pipeline_mode<synchronous>, transform_indices = @transform_5, window_bounds = array<i64: 256, 128>}, {pipeline_mode = #tpu.pipeline_mode<synchronous>, transform_indices = @transform_6, window_bounds = array<i64: 1, 128>}, {transform_indices = @transform_7, window_bounds = array<i64: 8, 128>}]} {
    %c0 = arith.constant 0 : index
    %c0_0 = arith.constant 0 : index
    %0 = vector.load %arg1[%c0, %c0_0] : memref<8x16xf32, #tpu.memory_space<vmem>>, vector<8x16xf32>
    %1 = arith.truncf %0 : vector<8x16xf32> to vector<8x16xbf16>
    %c0_1 = arith.constant 0 : index
    %c0_2 = arith.constant 0 : index
    %2 = vector.load %arg2[%c0_1, %c0_2] : memref<16x256xbf16, #tpu.memory_space<vmem>>, vector<16x256xbf16>
    %cst = arith.constant dense<0.000000e+00> : vector<8x256xf32>
    %3 = tpu.matmul %1, %2, %cst {dimension_numbers = #tpu.dot_dimension_numbers<[1], [0], [0], [1], [0, 0, 1, 1], [], []>} : vector<8x16xbf16>, vector<16x256xbf16>, vector<8x256xf32> -> vector<8x256xf32>
    %c0_3 = arith.constant 0 : index
    %c0_4 = arith.constant 0 : index
    %4 = vector.load %arg3[%c0_3, %c0_4] : memref<1x256xf32, #tpu.memory_space<vmem>>, vector<1x256xf32>
    %5 = vector.broadcast %4 : vector<1x256xf32> to vector<8x256xf32>
    %6 = arith.addf %3, %5 : vector<8x256xf32>
    %cst_5 = arith.constant 0.000000e+00 : f32
    %7 = vector.broadcast %cst_5 : f32 to vector<8x256xf32>
    %8 = arith.maximumf %6, %7 : vector<8x256xf32>
    %9 = arith.truncf %8 : vector<8x256xf32> to vector<8x256xbf16>
    %c0_6 = arith.constant 0 : index
    %c0_7 = arith.constant 0 : index
    %10 = vector.load %arg4[%c0_6, %c0_7] : memref<256x256xbf16, #tpu.memory_space<vmem>>, vector<256x256xbf16>
    %cst_8 = arith.constant dense<0.000000e+00> : vector<8x256xf32>
    %11 = tpu.matmul %9, %10, %cst_8 {dimension_numbers = #tpu.dot_dimension_numbers<[1], [0], [0], [1], [0, 0, 1, 1], [], []>} : vector<8x256xbf16>, vector<256x256xbf16>, vector<8x256xf32> -> vector<8x256xf32>
    %c0_9 = arith.constant 0 : index
    %c0_10 = arith.constant 0 : index
    %12 = vector.load %arg5[%c0_9, %c0_10] : memref<1x256xf32, #tpu.memory_space<vmem>>, vector<1x256xf32>
    %13 = vector.broadcast %12 : vector<1x256xf32> to vector<8x256xf32>
    %14 = arith.addf %11, %13 : vector<8x256xf32>
    %cst_11 = arith.constant 0.000000e+00 : f32
    %15 = vector.broadcast %cst_11 : f32 to vector<8x256xf32>
    %16 = arith.maximumf %14, %15 : vector<8x256xf32>
    %17 = arith.truncf %16 : vector<8x256xf32> to vector<8x256xbf16>
    %c0_12 = arith.constant 0 : index
    %c0_13 = arith.constant 0 : index
    %18 = vector.load %arg6[%c0_12, %c0_13] : memref<256x128xbf16, #tpu.memory_space<vmem>>, vector<256x128xbf16>
    %cst_14 = arith.constant dense<0.000000e+00> : vector<8x128xf32>
    %19 = tpu.matmul %17, %18, %cst_14 {dimension_numbers = #tpu.dot_dimension_numbers<[1], [0], [0], [1], [0, 0, 1, 1], [], []>} : vector<8x256xbf16>, vector<256x128xbf16>, vector<8x128xf32> -> vector<8x128xf32>
    %c0_15 = arith.constant 0 : index
    %c0_16 = arith.constant 0 : index
    %20 = vector.load %arg7[%c0_15, %c0_16] : memref<1x128xf32, #tpu.memory_space<vmem>>, vector<1x128xf32>
    %21 = vector.broadcast %20 : vector<1x128xf32> to vector<8x128xf32>
    %22 = arith.addf %19, %21 : vector<8x128xf32>
    %23 = tpu.iota {dimensions = array<i32: 1>} : vector<8x128xi32>
    %cst_17 = arith.constant 9.99999997E-7 : f32
    %cst_18 = arith.constant 1.000000e+00 : f32
    %24 = vector.broadcast %cst_17 : f32 to vector<8x128xf32>
    %25 = arith.maximumf %24, %22 : vector<8x128xf32>
    %26 = vector.broadcast %cst_18 : f32 to vector<8x128xf32>
    %27 = arith.minimumf %26, %25 : vector<8x128xf32>
    %c2_i32 = arith.constant 2 : i32
    %28 = vector.broadcast %c2_i32 : i32 to vector<8x128xi32>
    %29 = arith.cmpi slt, %23, %28 : vector<8x128xi32>
    %30 = arith.select %29, %22, %27 : vector<8x128xi1>, vector<8x128xf32>
    %c0_19 = arith.constant 0 : index
    %c0_20 = arith.constant 0 : index
    %31 = vector.load %arg8[%c0_19, %c0_20] : memref<8x128xf32, #tpu.memory_space<vmem>>, vector<8x128xf32>
    tpu.vector_store %arg8[%c0_19, %c0_20], %30 {strides = array<i32>} : memref<8x128xf32, #tpu.memory_space<vmem>>, vector<8x128xf32>,
    return
  }
  func.func @transform_0(%arg0: i32) -> (i32, i32) {
    %c0_i32 = arith.constant 0 : i32
    %c0_i32_0 = arith.constant 0 : i32
    return %arg0, %c0_i32 : i32, i32
  }
  func.func @transform_1(%arg0: i32) -> (i32, i32) {
    %c0_i32 = arith.constant 0 : i32
    %c0_i32_0 = arith.constant 0 : i32
    %c0_i32_1 = arith.constant 0 : i32
    return %c0_i32, %c0_i32_0 : i32, i32
  }
  func.func @transform_2(%arg0: i32) -> (i32, i32) {
    %c0_i32 = arith.constant 0 : i32
    %c0_i32_0 = arith.constant 0 : i32
    %c0_i32_1 = arith.constant 0 : i32
    return %c0_i32, %c0_i32_0 : i32, i32
  }
  func.func @transform_3(%arg0: i32) -> (i32, i32) {
    %c0_i32 = arith.constant 0 : i32
    %c0_i32_0 = arith.constant 0 : i32
    %c0_i32_1 = arith.constant 0 : i32
    return %c0_i32, %c0_i32_0 : i32, i32
  }
  func.func @transform_4(%arg0: i32) -> (i32, i32) {
    %c0_i32 = arith.constant 0 : i32
    %c0_i32_0 = arith.constant 0 : i32
    %c0_i32_1 = arith.constant 0 : i32
    return %c0_i32, %c0_i32_0 : i32, i32
  }
  func.func @transform_5(%arg0: i32) -> (i32, i32) {
    %c0_i32 = arith.constant 0 : i32
    %c0_i32_0 = arith.constant 0 : i32
    %c0_i32_1 = arith.constant 0 : i32
    return %c0_i32, %c0_i32_0 : i32, i32
  }
  func.func @transform_6(%arg0: i32) -> (i32, i32) {
    %c0_i32 = arith.constant 0 : i32
    %c0_i32_0 = arith.constant 0 : i32
    %c0_i32_1 = arith.constant 0 : i32
    return %c0_i32, %c0_i32_0 : i32, i32
  }
  func.func @transform_7(%arg0: i32) -> (i32, i32) {
    %c0_i32 = arith.constant 0 : i32
    %c0_i32_0 = arith.constant 0 : i32
    return %arg0, %c0_i32 : i32, i32
  }
}

module attributes {stable_mosaic.version = 11 : i64} {
  func.func @actor_forward_kernel(%arg0: i32, %arg1: memref<8x16xf32, #tpu.memory_space<vmem>>, %arg2: memref<16x256xbf16, #tpu.memory_space<vmem>>, %arg3: memref<1x256xf32, #tpu.memory_space<vmem>>, %arg4: memref<256x256xbf16, #tpu.memory_space<vmem>>, %arg5: memref<1x256xf32, #tpu.memory_space<vmem>>, %arg6: memref<256x128xbf16, #tpu.memory_space<vmem>>, %arg7: memref<1x128xf32, #tpu.memory_space<vmem>>, %arg8: memref<8x128xf32, #tpu.memory_space<vmem>>) attributes {dimension_semantics = [#tpu.dimension_semantics<parallel>], iteration_bounds = array<i64: 1>, scalar_prefetch = 0 : i64, scratch_operands = 0 : i64, tpu.core_type = #tpu.core_type<tc>, window_params = [{transform_indices = @transform_0, window_bounds = array<i64: 8, 16>}, {pipeline_mode = #tpu.pipeline_mode<synchronous>, transform_indices = @transform_1, window_bounds = array<i64: 16, 256>}, {pipeline_mode = #tpu.pipeline_mode<synchronous>, transform_indices = @transform_2, window_bounds = array<i64: 1, 256>}, {pipeline_mode = #tpu.pipeline_mode<synchronous>, transform_indices = @transform_3, window_bounds = array<i64: 256, 256>}, {pipeline_mode = #tpu.pipeline_mode<synchronous>, transform_indices = @transform_4, window_bounds = array<i64: 1, 256>}, {pipeline_mode = #tpu.pipeline_mode<synchronous>, transform_indices = @transform_5, window_bounds = array<i64: 256, 128>}, {pipeline_mode = #tpu.pipeline_mode<synchronous>, transform_indices = @transform_6, window_bounds = array<i64: 1, 128>}, {transform_indices = @transform_7, window_bounds = array<i64: 8, 128>}]} {
    %c0 = arith.constant 0 : index
    %c0_0 = arith.constant 0 : index
    %0 = vector.load %arg1[%c0, %c0_0] : memref<8x16xf32, #tpu.memory_space<vmem>>, vector<8x16xf32>
    %1 = arith.truncf %0 : vector<8x16xf32> to vector<8x16xbf16>
    %c0_1 = arith.constant 0 : index
    %c0_2 = arith.constant 0 : index
    %2 = vector.load %arg2[%c0_1, %c0_2] : memref<16x256xbf16, #tpu.memory_space<vmem>>, vector<16x256xbf16>
    %cst = arith.constant dense<0.000000e+00> : vector<8x256xf32>
    %3 = tpu.matmul %1, %2, %cst {dimension_numbers = #tpu.dot_dimension_numbers<[1], [0], [0], [1], [0, 0, 1, 1], [], []>} : vector<8x16xbf16>, vector<16x256xbf16>, vector<8x256xf32> -> vector<8x256xf32>
    %c0_3 = arith.constant 0 : index
    %c0_4 = arith.constant 0 : index
    %4 = vector.load %arg3[%c0_3, %c0_4] : memref<1x256xf32, #tpu.memory_space<vmem>>, vector<1x256xf32>
    %5 = vector.broadcast %4 : vector<1x256xf32> to vector<8x256xf32>
    %6 = arith.addf %3, %5 : vector<8x256xf32>
    %cst_5 = arith.constant 0.000000e+00 : f32
    %7 = vector.broadcast %cst_5 : f32 to vector<8x256xf32>
    %8 = arith.maximumf %6, %7 : vector<8x256xf32>
    %9 = arith.truncf %8 : vector<8x256xf32> to vector<8x256xbf16>
    %c0_6 = arith.constant 0 : index
    %c0_7 = arith.constant 0 : index
    %10 = vector.load %arg4[%c0_6, %c0_7] : memref<256x256xbf16, #tpu.memory_space<vmem>>, vector<256x256xbf16>
    %cst_8 = arith.constant dense<0.000000e+00> : vector<8x256xf32>
    %11 = tpu.matmul %9, %10, %cst_8 {dimension_numbers = #tpu.dot_dimension_numbers<[1], [0], [0], [1], [0, 0, 1, 1], [], []>} : vector<8x256xbf16>, vector<256x256xbf16>, vector<8x256xf32> -> vector<8x256xf32>
    %c0_9 = arith.constant 0 : index
    %c0_10 = arith.constant 0 : index
    %12 = vector.load %arg5[%c0_9, %c0_10] : memref<1x256xf32, #tpu.memory_space<vmem>>, vector<1x256xf32>
    %13 = vector.broadcast %12 : vector<1x256xf32> to vector<8x256xf32>
    %14 = arith.addf %11, %13 : vector<8x256xf32>
    %cst_11 = arith.constant 0.000000e+00 : f32
    %15 = vector.broadcast %cst_11 : f32 to vector<8x256xf32>
    %16 = arith.maximumf %14, %15 : vector<8x256xf32>
    %17 = arith.truncf %16 : vector<8x256xf32> to vector<8x256xbf16>
    %c0_12 = arith.constant 0 : index
    %c0_13 = arith.constant 0 : index
    %18 = vector.load %arg6[%c0_12, %c0_13] : memref<256x128xbf16, #tpu.memory_space<vmem>>, vector<256x128xbf16>
    %cst_14 = arith.constant dense<0.000000e+00> : vector<8x128xf32>
    %19 = tpu.matmul %17, %18, %cst_14 {dimension_numbers = #tpu.dot_dimension_numbers<[1], [0], [0], [1], [0, 0, 1, 1], [], []>} : vector<8x256xbf16>, vector<256x128xbf16>, vector<8x128xf32> -> vector<8x128xf32>
    %c0_15 = arith.constant 0 : index
    %c0_16 = arith.constant 0 : index
    %20 = vector.load %arg7[%c0_15, %c0_16] : memref<1x128xf32, #tpu.memory_space<vmem>>, vector<1x128xf32>
    %21 = vector.broadcast %20 : vector<1x128xf32> to vector<8x128xf32>
    %22 = arith.addf %19, %21 : vector<8x128xf32>
    %23 = tpu.iota {dimensions = array<i32: 1>} : vector<8x128xi32>
    %cst_17 = arith.constant 9.99999997E-7 : f32
    %cst_18 = arith.constant 1.000000e+00 : f32
    %24 = vector.broadcast %cst_17 : f32 to vector<8x128xf32>
    %25 = arith.maximumf %24, %22 : vector<8x128xf32>
    %26 = vector.broadcast %cst_18 : f32 to vector<8x128xf32>
    %27 = arith.minimumf %26, %25 : vector<8x128xf32>
    %c2_i32 = arith.constant 2 : i32
    %28 = vector.broadcast %c2_i32 : i32 to vector<8x128xi32>
    %29 = arith.cmpi slt, %23, %28 : vector<8x128xi32>
    %30 = arith.select %29, %22, %27 : vector<8x128xi1>, vector<8x128xf32>
    %c0_19 = arith.constant 0 : index
    %c0_20 = arith.constant 0 : index
    %31 = vector.load %arg8[%c0_19, %c0_20] : memref<8x128xf32, #tpu.memory_space<vmem>>, vector<8x128xf32>
    tpu.vector_store %arg8[%c0_19, %c0_20], %30 {strides = array<i32>} : memref<8x128xf32, #tpu.memory_space<vmem>>, vector<8x128xf32>,
    return
  }
  func.func @transform_0(%arg0: i32) -> (i32, i32) {
    %c0_i32 = arith.constant 0 : i32
    %c0_i32_0 = arith.constant 0 : i32
    return %arg0, %c0_i32 : i32, i32
  }
  func.func @transform_1(%arg0: i32) -> (i32, i32) {
    %c0_i32 = arith.constant 0 : i32
    %c0_i32_0 = arith.constant 0 : i32
    %c0_i32_1 = arith.constant 0 : i32
    return %c0_i32, %c0_i32_0 : i32, i32
  }
  func.func @transform_2(%arg0: i32) -> (i32, i32) {
    %c0_i32 = arith.constant 0 : i32
    %c0_i32_0 = arith.constant 0 : i32
    %c0_i32_1 = arith.constant 0 : i32
    return %c0_i32, %c0_i32_0 : i32, i32
  }
  func.func @transform_3(%arg0: i32) -> (i32, i32) {
    %c0_i32 = arith.constant 0 : i32
    %c0_i32_0 = arith.constant 0 : i32
    %c0_i32_1 = arith.constant 0 : i32
    return %c0_i32, %c0_i32_0 : i32, i32
  }
  func.func @transform_4(%arg0: i32) -> (i32, i32) {
    %c0_i32 = arith.constant 0 : i32
    %c0_i32_0 = arith.constant 0 : i32
    %c0_i32_1 = arith.constant 0 : i32
    return %c0_i32, %c0_i32_0 : i32, i32
  }
  func.func @transform_5(%arg0: i32) -> (i32, i32) {
    %c0_i32 = arith.constant 0 : i32
    %c0_i32_0 = arith.constant 0 : i32
    %c0_i32_1 = arith.constant 0 : i32
    return %c0_i32, %c0_i32_0 : i32, i32
  }
  func.func @transform_6(%arg0: i32) -> (i32, i32) {
    %c0_i32 = arith.constant 0 : i32
    %c0_i32_0 = arith.constant 0 : i32
    %c0_i32_1 = arith.constant 0 : i32
    return %c0_i32, %c0_i32_0 : i32, i32
  }
  func.func @transform_7(%arg0: i32) -> (i32, i32) {
    %c0_i32 = arith.constant 0 : i32
    %c0_i32_0 = arith.constant 0 : i32
    return %arg0, %c0_i32 : i32, i32
  }
}

</mosaic_0001>

<bundles_post_ra>
// kernel: tpu_custom_call.1
= control target key start
LH: loop header
LB: loop body
LE: loop exit
PB: predicated region body
PF: predicated region fallthrough
CT: control target
= control target key end

     0   :  { %12 = vsyncpa [#allocation3], 0  ;;  %s937_s0 = inlined_call_operand.hbm [shape: f32[8,16], index: 0, kind: input, shape index: {}]   ;;  %s938_s1 = inlined_call_operand.hbm [shape: bf16[16,256], index: 1, kind: input, shape index: {}]   ;;  %s939_s2 = inlined_call_operand.vmem [shape: f32[1,256], index: 2, kind: input, shape index: {}]   ;;  %s940_s3 = inlined_call_operand.hbm [shape: bf16[256,256], index: 3, kind: input, shape index: {}]   ;;  %s941_s4 = inlined_call_operand.vmem [shape: f32[1,256], index: 4, kind: input, shape index: {}]   ;;  %s942_s5 = inlined_call_operand.hbm [shape: bf16[256,128], index: 5, kind: input, shape index: {}]   ;;  %s943_s6 = inlined_call_operand.vmem [shape: f32[1,128], index: 6, kind: input, shape index: {}]   ;;  %s944_s7 = inlined_call_operand.hbm [shape: f32[8,128], index: 7, kind: output, shape index: {}]  }
   0x1   :  { %13 = vsyncpa [#allocation6], 0 }
   0x2   :  { %14 = vsyncpa [#allocation9], 0 }
   0x3   :  { %15 = vsyncpa [#allocation4], 0  ;;  %s863_s24 = smov [#allocation5]  }
   0x4   :  { %s31_s25 = sshll.u32 %s863_s24, 4  ;;  %s32_s25 = int_to_ptr.vmem [resolvable:$true] %s31_s25 }
   0x5   :  { %s763_s26 = scalar_lea.vmem %s32_s25, 256  ;;  %p768_p1 = scmp.lt.s32.totalorder %s32_s25, %s32_s25 }
   0x6   :  { %p764_p0 = scmp.ne.s32.totalorder %s32_s25, %s763_s26  ;;  %p769_p2 = scmp.lt.s32.totalorder %s763_s26, %s763_s26 }
   0x8   :  { %p770_p3 = por %p769_p2, %p768_p1 }
   0xa   :  { %p771_p4 = pnand %p770_p3, %p764_p0 }
   0xc   :  { %774 = shalt.err (!%p771_p4)
}
   0xd   :  { %s864_s27 = smov 128   ;;  %s865_s28 = smov 8  }
   0xe   :  { %37 = dma.hbm_to_vmem [thread:$0]  %s938_s1, 256, %s32_s25, [#allocation6], %s864_s27, %s864_s27, %s865_s28  }
   0xf   :  { %s866_s8 = smov [#allocation2]   ;;  %s867_s10 = smov [#allocation7]  }
  0x10   :  { %s22_s9 = sshll.u32 %s866_s8, 4  ;;  %s45_s11 = sshll.u32 %s867_s10, 4  ;;  %s23_s9 = int_to_ptr.vmem [resolvable:$true] %s22_s9  ;;  %s46_s11 = int_to_ptr.vmem [resolvable:$true] %s45_s11 }
  0x11   :  { %s783_s12 = scalar_lea.vmem %s23_s9, 128  ;;  %p788_p6 = scmp.lt.s32.totalorder %s23_s9, %s23_s9 }
  0x12   :  { %p784_p5 = scmp.ne.s32.totalorder %s23_s9, %s783_s12  ;;  %p789_p7 = scmp.lt.s32.totalorder %s783_s12, %s783_s12 }
  0x14   :  { %p790_p8 = por %p789_p7, %p788_p6 }
  0x16   :  { %p791_p9 = pnand %p790_p8, %p784_p5 }
  0x18   :  { %794 = shalt.err (!%p791_p9)
}
  0x19   :  { %25 = dma.hbm_to_vmem [thread:$0]  %s937_s0, 128, %s23_s9, [#allocation3]  }
  0x1a   :  { %s803_s15 = scalar_lea.vmem %s46_s11, 4096  ;;  %p808_p11 = scmp.lt.s32.totalorder %s46_s11, %s46_s11 }
  0x1b   :  { %p804_p10 = scmp.ne.s32.totalorder %s46_s11, %s803_s15  ;;  %p809_p12 = scmp.lt.s32.totalorder %s803_s15, %s803_s15 }
  0x1d   :  { %p810_p13 = por %p809_p12, %p808_p11 }
  0x1f   :  { %p811_p0 = pnand %p810_p13, %p804_p10 }
  0x21   :  { %814 = shalt.err (!%p811_p0)
}
  0x22   :  { %51 = dma.hbm_to_vmem [thread:$0]  %s940_s3, 4096, %s46_s11, [#allocation6], %s864_s27, %s864_s27, %s865_s28  }
  0x23   :  { %s868_s17 = smov [#allocation8]  }
  0x24   :  { %s59_s18 = sshll.u32 %s868_s17, 4  ;;  %s60_s18 = int_to_ptr.vmem [resolvable:$true] %s59_s18 }
  0x25   :  { %s823_s19 = scalar_lea.vmem %s60_s18, 2048  ;;  %p828_p2 = scmp.lt.s32.totalorder %s60_s18, %s60_s18 }
  0x26   :  { %p824_p1 = scmp.ne.s32.totalorder %s60_s18, %s823_s19  ;;  %p829_p3 = scmp.lt.s32.totalorder %s823_s19, %s823_s19 }
  0x28   :  { %p830_p4 = por %p829_p3, %p828_p2 }
  0x2a   :  { %p831_p5 = pnand %p830_p4, %p824_p1 }
  0x2c   :  { %834 = shalt.err (!%p831_p5)
}
  0x2d   :  { %s869_s0 = smov 64   ;;  %s870_s20 = smov 4  }
  0x2e   :  { %65 = dma.hbm_to_vmem [thread:$0]  %s942_s5, 2048, %s60_s18, [#allocation9], %s869_s0, %s869_s0, %s870_s20  }
  0x2f   :  { %855 = dma.done.wait [#allocation3], 128  }
  0x30   :  { %856 = vsyncadd [#allocation3], 4294967168 }
  0x31   :  { %857 = dma.done.wait [#allocation6], 4352  }
  0x32   :  { %858 = vsyncadd [#allocation6], 4294962944 }
  0x33   :  { %859 = dma.done.wait [#allocation9], 2048  }
  0x34   :  { %860 = vsyncadd [#allocation9], 4294965248  ;;  %v871_v0 = vmov 0   ;;  %v688_v1 = vld [vmem:[#allocation5 + $0x4] ss:$8 sps:$4 sm:$0xff]   ;;  %v81_v3 = vld [vmem:[#allocation2] sm:$0xff]  ;;  %v87_v49 = vlaneseq }
  0x35   :  { %143 = vmatprep.mubr.bf16.mxu0 %v871_v0  ;;  %v690_v2 = vld [vmem:[#allocation5] ss:$8 sps:$4 sm:$0xff]   ;;  %125 = vmatprep.subr.bf16.mxu0 %v688_v1  ;;  %v82_v4 = vpack.c.bf16 %v81_v3, %v81_v3  ;;  %v691_v5 = vld [vmem:[#allocation7 + $0x74] ss:$8 sps:$4 sm:$0xff]   ;;  %vm107_vm0 = vcmask 130048   ;;  %v743_v41 = vld [vmem:[#allocation8 + $0x68] sm:$0xff]  }
  0x36   :  { %v693_v6 = vld [vmem:[#allocation7 + $0x70] ss:$8 sps:$4 sm:$0xff]   ;;  %126 = vmatpush1.bf16.msra.mxu0 %v690_v2  ;;  %v694_v7 = vld [vmem:[#allocation7 + $0x64] ss:$8 sps:$4 sm:$0xff]   ;;  %360 = vmatprep.subr.bf16.mxu1 %v691_v5  ;;  %v696_v8 = vld [vmem:[#allocation7 + $0x60] ss:$8 sps:$4 sm:$0xff]  }
  0x37   :  { %361 = vmatpush1.bf16.msra.mxu1 %v693_v6  ;;  %v697_v9 = vld [vmem:[#allocation7 + $0x54] ss:$8 sps:$4 sm:$0xff]   ;;  %v699_v10 = vld [vmem:[#allocation7 + $0x50] ss:$8 sps:$4 sm:$0xff]   ;;  %v700_v11 = vld [vmem:[#allocation7 + $0x44] ss:$8 sps:$4 sm:$0xff]  }
  0x38   :  { %362 = vmatprep.subr.bf16.mxu1 %v694_v7  ;;  %v702_v12 = vld [vmem:[#allocation7 + $0x40] ss:$8 sps:$4 sm:$0xff]   ;;  %v703_v13 = vld [vmem:[#allocation7 + $0x34] ss:$8 sps:$4 sm:$0xff]   ;;  %v705_v14 = vld [vmem:[#allocation7 + $0x30] ss:$8 sps:$4 sm:$0xff]  }
  0x39   :  { %606 = vmatmul.mubr.msk.bf16.vlgmr.msra.gmra.mxu0 %vm107_vm0, %v82_v4  ;;  %v706_v15 = vld [vmem:[#allocation7 + $0x24] ss:$8 sps:$4 sm:$0xff]   ;;  %v708_v16 = vld [vmem:[#allocation7 + $0x20] ss:$8 sps:$4 sm:$0xff]   ;;  %v709_v17 = vld [vmem:[#allocation7 + $0x14] ss:$8 sps:$4 sm:$0xff]  }
  0x3a   :  { %v711_v18 = vld [vmem:[#allocation7 + $0x10] ss:$8 sps:$4 sm:$0xff]   ;;  %v712_v19 = vld [vmem:[#allocation7 + $0x4] ss:$8 sps:$4 sm:$0xff]   ;;  %v714_v20 = vld [vmem:[#allocation7] ss:$8 sps:$4 sm:$0xff]  }
  0x3b   :  { %363 = vmatpush1.bf16.msra.mxu1 %v696_v8  ;;  %v715_v21 = vld [vmem:[#allocation7 + $0xf4] ss:$8 sps:$4 sm:$0xff]   ;;  %v717_v22 = vld [vmem:[#allocation7 + $0xf0] ss:$8 sps:$4 sm:$0xff]   ;;  %v718_v23 = vld [vmem:[#allocation7 + $0xe4] ss:$8 sps:$4 sm:$0xff]  }
  0x3c   :  { %364 = vmatprep.subr.bf16.mxu1 %v697_v9  ;;  %v720_v24 = vld [vmem:[#allocation7 + $0xe0] ss:$8 sps:$4 sm:$0xff]   ;;  %v721_v25 = vld [vmem:[#allocation7 + $0xd4] ss:$8 sps:$4 sm:$0xff]   ;;  %v723_v26 = vld [vmem:[#allocation7 + $0xd0] ss:$8 sps:$4 sm:$0xff]  }
  0x3d   :  { %v724_v27 = vld [vmem:[#allocation7 + $0xc4] ss:$8 sps:$4 sm:$0xff]   ;;  %v726_v28 = vld [vmem:[#allocation7 + $0xc0] ss:$8 sps:$4 sm:$0xff]   ;;  %v727_v29 = vld [vmem:[#allocation7 + $0xb4] ss:$8 sps:$4 sm:$0xff]  }
  0x3e   :  { %v729_v30 = vld [vmem:[#allocation7 + $0xb0] ss:$8 sps:$4 sm:$0xff]   ;;  %v730_v31 = vld [vmem:[#allocation7 + $0xa4] ss:$8 sps:$4 sm:$0xff]   ;;  %v732_v32 = vld [vmem:[#allocation7 + $0xa0] ss:$8 sps:$4 sm:$0xff]  }
  0x3f   :  { %365 = vmatpush1.bf16.msra.mxu1 %v699_v10  ;;  %v733_v33 = vld [vmem:[#allocation7 + $0x94] ss:$8 sps:$4 sm:$0xff]   ;;  %v735_v34 = vld [vmem:[#allocation7 + $0x90] ss:$8 sps:$4 sm:$0xff]   ;;  %v736_v35 = vld [vmem:[#allocation7 + $0x84] ss:$8 sps:$4 sm:$0xff]  }
  0x40   :  { %366 = vmatprep.subr.bf16.mxu1 %v700_v11  ;;  %v738_v36 = vld [vmem:[#allocation7 + $0x80] ss:$8 sps:$4 sm:$0xff]   ;;  %v739_v37 = vld [vmem:[#allocation8 + $0x78] sm:$0xff]   ;;  %v741_v39 = vld [vmem:[#allocation8 + $0x70] sm:$0xff]   ;;  %v88_v50 = vshrl.u32 %v87_v49, 7 }
  0x41   :  { %v740_v38 = vld [vmem:[#allocation8 + $0x38] sm:$0xff]   ;;  %656 = vmatprep.subr.bf16.mxu0 %v739_v37  ;;  %v742_v40 = vld [vmem:[#allocation8 + $0x30] sm:$0xff]   ;;  %v744_v42 = vld [vmem:[#allocation8 + $0x28] sm:$0xff]  }
  0x42   :  { %657 = vmatpush3.bf16.msra.mxu0 %v740_v38  ;;  %v745_v43 = vld [vmem:[#allocation8 + $0x60] sm:$0xff]   ;;  %v747_v45 = vld [vmem:[#allocation8 + $0x58] sm:$0xff]   ;;  %v749_v47 = vld [vmem:[#allocation8 + $0x50] sm:$0xff]   ;;  %v89_v51 = vsub.s32 0, %v88_v50  ;;  %v93_v53 = vsub.s32 1, %v88_v50 }
  0x43   :  { %367 = vmatpush1.bf16.msra.mxu1 %v702_v12  ;;  %658 = vmatprep.subr.bf16.mxu0 %v741_v39  ;;  %v746_v44 = vld [vmem:[#allocation8 + $0x20] sm:$0xff]   ;;  %v748_v46 = vld [vmem:[#allocation8 + $0x18] sm:$0xff]   ;;  %v750_v48 = vld [vmem:[#allocation8 + $0x10] sm:$0xff]  }
  0x44   :  { %368 = vmatprep.subr.bf16.mxu1 %v703_v13  ;;  %v85_v52 = vld [vmem:[%s939_s2] sm:$0x3]  ;;  %v753_v4 = vld [vmem:[#allocation8 + $0x40] sm:$0xff]  }
  0x45   :  { %v90_v54 = vrot.slane %v85_v52, %v89_v51  ;;  %v94_v55 = vrot.slane %v85_v52, %v93_v53  ;;  %v751_v2 = vld [vmem:[#allocation8 + $0x48] sm:$0xff]   ;;  %v754_v5 = vld [vmem:[#allocation8] sm:$0xff]  }
  0x46   :  { %659 = vmatpush3.bf16.msra.mxu0 %v742_v40  ;;  %v752_v3 = vld [vmem:[#allocation8 + $0x8] sm:$0xff]  }
  0x47   :  { %369 = vmatpush1.bf16.msra.mxu1 %v705_v14  ;;  %660 = vmatprep.subr.bf16.mxu0 %v743_v41  ;;  %v188_v6 = vld [vmem:[%s941_s4] sm:$0x3]  ;;  %s872_s4 = smov [#allocation10]  }
  0x48   :  { %370 = vmatprep.subr.bf16.mxu1 %v706_v15  ;;  %v193_v7 = vrot.slane %v188_v6, %v89_v51  ;;  %v197_v8 = vrot.slane %v188_v6, %v93_v53  ;;  %s593_s26 = sshll.u32 %s872_s4, 4  ;;  %s594_s26 = int_to_ptr.vmem [resolvable:$true] %s593_s26 }
  0x49   :  { %s835_s27 = scalar_lea.vmem %s594_s26, 128  ;;  %p840_p7 = scmp.lt.s32.totalorder %s594_s26, %s594_s26 }
  0x4a   :  { %661 = vmatpush3.bf16.msra.mxu0 %v744_v42  ;;  %p836_p6 = scmp.ne.s32.totalorder %s594_s26, %s835_s27  ;;  %p841_p8 = scmp.lt.s32.totalorder %s835_s27, %s835_s27 }
  0x4b   :  { %371 = vmatpush1.bf16.msra.mxu1 %v708_v16  ;;  %662 = vmatprep.subr.bf16.mxu0 %v745_v43 }
  0x4c   :  { %372 = vmatprep.subr.bf16.mxu1 %v709_v17  ;;  %p842_p9 = por %p841_p8, %p840_p7 }
  0x4e   :  { %663 = vmatpush3.bf16.msra.mxu0 %v746_v44  ;;  %p843_p10 = pnand %p842_p9, %p836_p6 }
  0x4f   :  { %373 = vmatpush1.bf16.msra.mxu1 %v711_v18  ;;  %664 = vmatprep.subr.bf16.mxu0 %v747_v45 }
  0x50   :  { %374 = vmatprep.subr.bf16.mxu1 %v712_v19 }
  0x52   :  { %665 = vmatpush3.bf16.msra.mxu0 %v748_v46 }
  0x53   :  { %375 = vmatpush1.bf16.msra.mxu1 %v714_v20  ;;  %666 = vmatprep.subr.bf16.mxu0 %v749_v47  ;;  %v639_v20 = vld [vmem:[%s943_s6] ss:$0 sm:$0xff] }
  0x54   :  { %376 = vmatprep.subr.bf16.mxu1 %v715_v21 }
  0x56   :  { %667 = vmatpush3.bf16.msra.mxu0 %v750_v48 }
  0x57   :  { %377 = vmatpush2.bf16.msra.mxu1 %v717_v22  ;;  %668 = vmatprep.subr.bf16.mxu0 %v751_v2 }
  0x58   :  { %378 = vmatprep.subr.bf16.mxu1 %v718_v23 }
  0x5a   :  { %669 = vmatpush3.bf16.msra.mxu0 %v752_v3 }
  0x5b   :  { %379 = vmatpush2.bf16.msra.mxu1 %v720_v24  ;;  %670 = vmatprep.subr.bf16.mxu0 %v753_v4  ;;  %v581_v24 = vand.u32 127, %v87_v49 }
  0x5c   :  { %380 = vmatprep.subr.bf16.mxu1 %v721_v25 }
  0x5d   :  { %vm584_vm1 = vcmp.lt.s32.totalorder %v581_v24, 2 }
  0x5e   :  { %671 = vmatpush3.bf16.msra.mxu0 %v754_v5 }
  0x5f   :  { %381 = vmatpush2.bf16.msra.mxu1 %v723_v26 }
  0x60   :  { %382 = vmatprep.subr.bf16.mxu1 %v724_v27 }
  0x63   :  { %383 = vmatpush2.bf16.msra.mxu1 %v726_v28 }
  0x64   :  { %384 = vmatprep.subr.bf16.mxu1 %v727_v29 }
  0x67   :  { %385 = vmatpush2.bf16.msra.mxu1 %v729_v30 }
  0x68   :  { %386 = vmatprep.subr.bf16.mxu1 %v730_v31 }
  0x6b   :  { %387 = vmatpush2.bf16.msra.mxu1 %v732_v32 }
  0x6c   :  { %388 = vmatprep.subr.bf16.mxu1 %v733_v33 }
  0x6f   :  { %389 = vmatpush2.bf16.msra.mxu1 %v735_v34 }
  0x70   :  { %390 = vmatprep.subr.bf16.mxu1 %v736_v35 }
  0x73   :  { %391 = vmatpush2.bf16.msra.mxu1 %v738_v36 }
  0xf9   :  { %v145_v56 = vpop.f32.mrf.mxu0 }
  0xfa   :  { %v146_v57 = vadd.f32 %v145_v56, %v90_v54 }
  0xfb   :  { %v147_v58 = vpop.f32.mrf.mxu0 }
  0xfc   :  { %v148_v59 = vadd.f32 %v147_v58, %v94_v55  ;;  %v152_v60 = vmax.f32 %v146_v57, 0.0 }
  0xfd   :  { %v149_v61 = vpop.f32.mrf.mxu0 }
  0xfe   :  { %v153_v62 = vmax.f32 %v148_v59, 0.0  ;;  %v154_v1 = vpack.c.bf16 %v152_v60, %v152_v60 }
  0xff   :  { %v150_v63 = vpop.f32.mrf.mxu0 }
 0x100   :  { %v155_v0 = vpack.c.bf16 %v153_v62, %v153_v62 }
 0x102   :  { %392 = vmatprep.mubr.bf16.mxu1 %v155_v0 }
 0x103   :  { %393 = vmatmul.mubr.bf16.vlgmr.msra.gmra.mxu1 %v154_v1 }
 0x1c3   :  { %v394_v9 = vpop.f32.mrf.mxu1 }
 0x1c4   :  { %v395_v10 = vadd.f32 %v394_v9, %v193_v7 }
 0x1c5   :  { %v396_v11 = vpop.f32.mrf.mxu1 }
 0x1c6   :  { %v397_v12 = vadd.f32 %v396_v11, %v197_v8  ;;  %v401_v13 = vmax.f32 %v395_v10, 0.0 }
 0x1c7   :  { %v398_v14 = vpop.f32.mrf.mxu1 }
 0x1c8   :  { %v402_v15 = vmax.f32 %v397_v12, 0.0  ;;  %v403_v18 = vpack.c.bf16 %v401_v13, %v401_v13 }
 0x1c9   :  { %v399_v16 = vpop.f32.mrf.mxu1 }
 0x1ca   :  { %v404_v17 = vpack.c.bf16 %v402_v15, %v402_v15 }
 0x1cc   :  { %572 = vmatprep.mubr.bf16.mxu0 %v404_v17 }
 0x1cd   :  { %573 = vmatmul.mubr.bf16.vlgmr.msra.gmra.mxu0 %v403_v18 }
 0x28d   :  { %v672_v19 = vpop.f32.mrf.mxu0 }
 0x28f   :  { %v673_v21 = vpop.f32.mrf.mxu0 }
 0x290   :  { %v674_v22 = vadd.f32 %v673_v21, %v672_v19 }
 0x291   :  { %v675_v23 = vpop.f32.mrf.mxu0 }
 0x292   :  { %v575_v25 = vadd.f32 %v674_v22, %v639_v20 }
 0x293   :  { %v676_v26 = vpop.f32.mrf.mxu0 }
 0x294   :  { %v582_v27 = vmax.f32 %v575_v25, 1e-06 }
 0x296   :  { %v583_v28 = vmin.f32 %v582_v27, 1.0 }
 0x298   :  { %v585_v29 = vsel %vm584_vm1, %v575_v25, %v583_v28 }
 0x299   :  { %586 = vst [vmem:[#allocation10] sm:$0xff] %v585_v29 }
 0x29a   :  { %846 = shalt.err (!%p843_p10)
}
 0x29b   :  { %596 = dma.vmem_to_hbm [thread:$0]  %s594_s26, 128, %s944_s7, [#allocation4]  }
 0x29c   :  { %861 = dma.done.wait [#allocation4], 128  }
 0x29d   :  { %862 = vsyncadd [#allocation4], 4294967168 }
 0x29e   :  { %600 = vsyncpa [#allocation3], 1 }
 0x29f   :  { %601 = vsyncpa [#allocation6], 1 }
 0x2a0   :  { %602 = vsyncpa [#allocation9], 1 }
 0x2a1   :  { %603 = vsyncpa [#allocation4], 1 }

// kernel: tpu_custom_call.1
= control target key start
LH: loop header
LB: loop body
LE: loop exit
PB: predicated region body
PF: predicated region fallthrough
CT: control target
= control target key end

     0   :  { %12 = vsyncpa [#allocation3], 0  ;;  %s937_s0 = inlined_call_operand.hbm [shape: f32[8,16], index: 0, kind: input, shape index: {}]   ;;  %s938_s1 = inlined_call_operand.hbm [shape: bf16[16,256], index: 1, kind: input, shape index: {}]   ;;  %s939_s2 = inlined_call_operand.vmem [shape: f32[1,256], index: 2, kind: input, shape index: {}]   ;;  %s940_s3 = inlined_call_operand.hbm [shape: bf16[256,256], index: 3, kind: input, shape index: {}]   ;;  %s941_s4 = inlined_call_operand.vmem [shape: f32[1,256], index: 4, kind: input, shape index: {}]   ;;  %s942_s5 = inlined_call_operand.hbm [shape: bf16[256,128], index: 5, kind: input, shape index: {}]   ;;  %s943_s6 = inlined_call_operand.vmem [shape: f32[1,128], index: 6, kind: input, shape index: {}]   ;;  %s944_s7 = inlined_call_operand.hbm [shape: f32[8,128], index: 7, kind: output, shape index: {}]  }
   0x1   :  { %13 = vsyncpa [#allocation6], 0 }
   0x2   :  { %14 = vsyncpa [#allocation9], 0 }
   0x3   :  { %15 = vsyncpa [#allocation4], 0  ;;  %s863_s24 = smov [#allocation5]  }
   0x4   :  { %s31_s25 = sshll.u32 %s863_s24, 4  ;;  %s32_s25 = int_to_ptr.vmem [resolvable:$true] %s31_s25 }
   0x5   :  { %s763_s26 = scalar_lea.vmem %s32_s25, 256  ;;  %p768_p1 = scmp.lt.s32.totalorder %s32_s25, %s32_s25 }
   0x6   :  { %p764_p0 = scmp.ne.s32.totalorder %s32_s25, %s763_s26  ;;  %p769_p2 = scmp.lt.s32.totalorder %s763_s26, %s763_s26 }
   0x8   :  { %p770_p3 = por %p769_p2, %p768_p1 }
   0xa   :  { %p771_p4 = pnand %p770_p3, %p764_p0 }
   0xc   :  { %774 = shalt.err (!%p771_p4)
}
   0xd   :  { %s864_s27 = smov 128   ;;  %s865_s28 = smov 8  }
   0xe   :  { %37 = dma.hbm_to_vmem [thread:$0]  %s938_s1, 256, %s32_s25, [#allocation6], %s864_s27, %s864_s27, %s865_s28  }
   0xf   :  { %s866_s8 = smov [#allocation2]   ;;  %s867_s10 = smov [#allocation7]  }
  0x10   :  { %s22_s9 = sshll.u32 %s866_s8, 4  ;;  %s45_s11 = sshll.u32 %s867_s10, 4  ;;  %s23_s9 = int_to_ptr.vmem [resolvable:$true] %s22_s9  ;;  %s46_s11 = int_to_ptr.vmem [resolvable:$true] %s45_s11 }
  0x11   :  { %s783_s12 = scalar_lea.vmem %s23_s9, 128  ;;  %p788_p6 = scmp.lt.s32.totalorder %s23_s9, %s23_s9 }
  0x12   :  { %p784_p5 = scmp.ne.s32.totalorder %s23_s9, %s783_s12  ;;  %p789_p7 = scmp.lt.s32.totalorder %s783_s12, %s783_s12 }
  0x14   :  { %p790_p8 = por %p789_p7, %p788_p6 }
  0x16   :  { %p791_p9 = pnand %p790_p8, %p784_p5 }
  0x18   :  { %794 = shalt.err (!%p791_p9)
}
  0x19   :  { %25 = dma.hbm_to_vmem [thread:$0]  %s937_s0, 128, %s23_s9, [#allocation3]  }
  0x1a   :  { %s803_s15 = scalar_lea.vmem %s46_s11, 4096  ;;  %p808_p11 = scmp.lt.s32.totalorder %s46_s11, %s46_s11 }
  0x1b   :  { %p804_p10 = scmp.ne.s32.totalorder %s46_s11, %s803_s15  ;;  %p809_p12 = scmp.lt.s32.totalorder %s803_s15, %s803_s15 }
  0x1d   :  { %p810_p13 = por %p809_p12, %p808_p11 }
  0x1f   :  { %p811_p0 = pnand %p810_p13, %p804_p10 }
  0x21   :  { %814 = shalt.err (!%p811_p0)
}
  0x22   :  { %51 = dma.hbm_to_vmem [thread:$0]  %s940_s3, 4096, %s46_s11, [#allocation6], %s864_s27, %s864_s27, %s865_s28  }
  0x23   :  { %s868_s17 = smov [#allocation8]  }
  0x24   :  { %s59_s18 = sshll.u32 %s868_s17, 4  ;;  %s60_s18 = int_to_ptr.vmem [resolvable:$true] %s59_s18 }
  0x25   :  { %s823_s19 = scalar_lea.vmem %s60_s18, 2048  ;;  %p828_p2 = scmp.lt.s32.totalorder %s60_s18, %s60_s18 }
  0x26   :  { %p824_p1 = scmp.ne.s32.totalorder %s60_s18, %s823_s19  ;;  %p829_p3 = scmp.lt.s32.totalorder %s823_s19, %s823_s19 }
  0x28   :  { %p830_p4 = por %p829_p3, %p828_p2 }
  0x2a   :  { %p831_p5 = pnand %p830_p4, %p824_p1 }
  0x2c   :  { %834 = shalt.err (!%p831_p5)
}
  0x2d   :  { %s869_s0 = smov 64   ;;  %s870_s20 = smov 4  }
  0x2e   :  { %65 = dma.hbm_to_vmem [thread:$0]  %s942_s5, 2048, %s60_s18, [#allocation9], %s869_s0, %s869_s0, %s870_s20  }
  0x2f   :  { %855 = dma.done.wait [#allocation3], 128  }
  0x30   :  { %856 = vsyncadd [#allocation3], 4294967168 }
  0x31   :  { %857 = dma.done.wait [#allocation6], 4352  }
  0x32   :  { %858 = vsyncadd [#allocation6], 4294962944 }
  0x33   :  { %859 = dma.done.wait [#allocation9], 2048  }
  0x34   :  { %860 = vsyncadd [#allocation9], 4294965248  ;;  %v871_v0 = vmov 0   ;;  %v688_v1 = vld [vmem:[#allocation5 + $0x4] ss:$8 sps:$4 sm:$0xff]   ;;  %v81_v3 = vld [vmem:[#allocation2] sm:$0xff]  ;;  %v87_v49 = vlaneseq }
  0x35   :  { %143 = vmatprep.mubr.bf16.mxu0 %v871_v0  ;;  %v690_v2 = vld [vmem:[#allocation5] ss:$8 sps:$4 sm:$0xff]   ;;  %125 = vmatprep.subr.bf16.mxu0 %v688_v1  ;;  %v82_v4 = vpack.c.bf16 %v81_v3, %v81_v3  ;;  %v691_v5 = vld [vmem:[#allocation7 + $0x74] ss:$8 sps:$4 sm:$0xff]   ;;  %vm107_vm0 = vcmask 130048   ;;  %v743_v41 = vld [vmem:[#allocation8 + $0x68] sm:$0xff]  }
  0x36   :  { %v693_v6 = vld [vmem:[#allocation7 + $0x70] ss:$8 sps:$4 sm:$0xff]   ;;  %126 = vmatpush1.bf16.msra.mxu0 %v690_v2  ;;  %v694_v7 = vld [vmem:[#allocation7 + $0x64] ss:$8 sps:$4 sm:$0xff]   ;;  %360 = vmatprep.subr.bf16.mxu1 %v691_v5  ;;  %v696_v8 = vld [vmem:[#allocation7 + $0x60] ss:$8 sps:$4 sm:$0xff]  }
  0x37   :  { %361 = vmatpush1.bf16.msra.mxu1 %v693_v6  ;;  %v697_v9 = vld [vmem:[#allocation7 + $0x54] ss:$8 sps:$4 sm:$0xff]   ;;  %v699_v10 = vld [vmem:[#allocation7 + $0x50] ss:$8 sps:$4 sm:$0xff]   ;;  %v700_v11 = vld [vmem:[#allocation7 + $0x44] ss:$8 sps:$4 sm:$0xff]  }
  0x38   :  { %362 = vmatprep.subr.bf16.mxu1 %v694_v7  ;;  %v702_v12 = vld [vmem:[#allocation7 + $0x40] ss:$8 sps:$4 sm:$0xff]   ;;  %v703_v13 = vld [vmem:[#allocation7 + $0x34] ss:$8 sps:$4 sm:$0xff]   ;;  %v705_v14 = vld [vmem:[#allocation7 + $0x30] ss:$8 sps:$4 sm:$0xff]  }
  0x39   :  { %606 = vmatmul.mubr.msk.bf16.vlgmr.msra.gmra.mxu0 %vm107_vm0, %v82_v4  ;;  %v706_v15 = vld [vmem:[#allocation7 + $0x24] ss:$8 sps:$4 sm:$0xff]   ;;  %v708_v16 = vld [vmem:[#allocation7 + $0x20] ss:$8 sps:$4 sm:$0xff]   ;;  %v709_v17 = vld [vmem:[#allocation7 + $0x14] ss:$8 sps:$4 sm:$0xff]  }
  0x3a   :  { %v711_v18 = vld [vmem:[#allocation7 + $0x10] ss:$8 sps:$4 sm:$0xff]   ;;  %v712_v19 = vld [vmem:[#allocation7 + $0x4] ss:$8 sps:$4 sm:$0xff]   ;;  %v714_v20 = vld [vmem:[#allocation7] ss:$8 sps:$4 sm:$0xff]  }
  0x3b   :  { %363 = vmatpush1.bf16.msra.mxu1 %v696_v8  ;;  %v715_v21 = vld [vmem:[#allocation7 + $0xf4] ss:$8 sps:$4 sm:$0xff]   ;;  %v717_v22 = vld [vmem:[#allocation7 + $0xf0] ss:$8 sps:$4 sm:$0xff]   ;;  %v718_v23 = vld [vmem:[#allocation7 + $0xe4] ss:$8 sps:$4 sm:$0xff]  }
  0x3c   :  { %364 = vmatprep.subr.bf16.mxu1 %v697_v9  ;;  %v720_v24 = vld [vmem:[#allocation7 + $0xe0] ss:$8 sps:$4 sm:$0xff]   ;;  %v721_v25 = vld [vmem:[#allocation7 + $0xd4] ss:$8 sps:$4 sm:$0xff]   ;;  %v723_v26 = vld [vmem:[#allocation7 + $0xd0] ss:$8 sps:$4 sm:$0xff]  }
  0x3d   :  { %v724_v27 = vld [vmem:[#allocation7 + $0xc4] ss:$8 sps:$4 sm:$0xff]   ;;  %v726_v28 = vld [vmem:[#allocation7 + $0xc0] ss:$8 sps:$4 sm:$0xff]   ;;  %v727_v29 = vld [vmem:[#allocation7 + $0xb4] ss:$8 sps:$4 sm:$0xff]  }
  0x3e   :  { %v729_v30 = vld [vmem:[#allocation7 + $0xb0] ss:$8 sps:$4 sm:$0xff]   ;;  %v730_v31 = vld [vmem:[#allocation7 + $0xa4] ss:$8 sps:$4 sm:$0xff]   ;;  %v732_v32 = vld [vmem:[#allocation7 + $0xa0] ss:$8 sps:$4 sm:$0xff]  }
  0x3f   :  { %365 = vmatpush1.bf16.msra.mxu1 %v699_v10  ;;  %v733_v33 = vld [vmem:[#allocation7 + $0x94] ss:$8 sps:$4 sm:$0xff]   ;;  %v735_v34 = vld [vmem:[#allocation7 + $0x90] ss:$8 sps:$4 sm:$0xff]   ;;  %v736_v35 = vld [vmem:[#allocation7 + $0x84] ss:$8 sps:$4 sm:$0xff]  }
  0x40   :  { %366 = vmatprep.subr.bf16.mxu1 %v700_v11  ;;  %v738_v36 = vld [vmem:[#allocation7 + $0x80] ss:$8 sps:$4 sm:$0xff]   ;;  %v739_v37 = vld [vmem:[#allocation8 + $0x78] sm:$0xff]   ;;  %v741_v39 = vld [vmem:[#allocation8 + $0x70] sm:$0xff]   ;;  %v88_v50 = vshrl.u32 %v87_v49, 7 }
  0x41   :  { %v740_v38 = vld [vmem:[#allocation8 + $0x38] sm:$0xff]   ;;  %656 = vmatprep.subr.bf16.mxu0 %v739_v37  ;;  %v742_v40 = vld [vmem:[#allocation8 + $0x30] sm:$0xff]   ;;  %v744_v42 = vld [vmem:[#allocation8 + $0x28] sm:$0xff]  }
  0x42   :  { %657 = vmatpush3.bf16.msra.mxu0 %v740_v38  ;;  %v745_v43 = vld [vmem:[#allocation8 + $0x60] sm:$0xff]   ;;  %v747_v45 = vld [vmem:[#allocation8 + $0x58] sm:$0xff]   ;;  %v749_v47 = vld [vmem:[#allocation8 + $0x50] sm:$0xff]   ;;  %v89_v51 = vsub.s32 0, %v88_v50  ;;  %v93_v53 = vsub.s32 1, %v88_v50 }
  0x43   :  { %367 = vmatpush1.bf16.msra.mxu1 %v702_v12  ;;  %658 = vmatprep.subr.bf16.mxu0 %v741_v39  ;;  %v746_v44 = vld [vmem:[#allocation8 + $0x20] sm:$0xff]   ;;  %v748_v46 = vld [vmem:[#allocation8 + $0x18] sm:$0xff]   ;;  %v750_v48 = vld [vmem:[#allocation8 + $0x10] sm:$0xff]  }
  0x44   :  { %368 = vmatprep.subr.bf16.mxu1 %v703_v13  ;;  %v85_v52 = vld [vmem:[%s939_s2] sm:$0x3]  ;;  %v753_v4 = vld [vmem:[#allocation8 + $0x40] sm:$0xff]  }
  0x45   :  { %v90_v54 = vrot.slane %v85_v52, %v89_v51  ;;  %v94_v55 = vrot.slane %v85_v52, %v93_v53  ;;  %v751_v2 = vld [vmem:[#allocation8 + $0x48] sm:$0xff]   ;;  %v754_v5 = vld [vmem:[#allocation8] sm:$0xff]  }
  0x46   :  { %659 = vmatpush3.bf16.msra.mxu0 %v742_v40  ;;  %v752_v3 = vld [vmem:[#allocation8 + $0x8] sm:$0xff]  }
  0x47   :  { %369 = vmatpush1.bf16.msra.mxu1 %v705_v14  ;;  %660 = vmatprep.subr.bf16.mxu0 %v743_v41  ;;  %v188_v6 = vld [vmem:[%s941_s4] sm:$0x3]  ;;  %s872_s4 = smov [#allocation10]  }
  0x48   :  { %370 = vmatprep.subr.bf16.mxu1 %v706_v15  ;;  %v193_v7 = vrot.slane %v188_v6, %v89_v51  ;;  %v197_v8 = vrot.slane %v188_v6, %v93_v53  ;;  %s593_s26 = sshll.u32 %s872_s4, 4  ;;  %s594_s26 = int_to_ptr.vmem [resolvable:$true] %s593_s26 }
  0x49   :  { %s835_s27 = scalar_lea.vmem %s594_s26, 128  ;;  %p840_p7 = scmp.lt.s32.totalorder %s594_s26, %s594_s26 }
  0x4a   :  { %661 = vmatpush3.bf16.msra.mxu0 %v744_v42  ;;  %p836_p6 = scmp.ne.s32.totalorder %s594_s26, %s835_s27  ;;  %p841_p8 = scmp.lt.s32.totalorder %s835_s27, %s835_s27 }
  0x4b   :  { %371 = vmatpush1.bf16.msra.mxu1 %v708_v16  ;;  %662 = vmatprep.subr.bf16.mxu0 %v745_v43 }
  0x4c   :  { %372 = vmatprep.subr.bf16.mxu1 %v709_v17  ;;  %p842_p9 = por %p841_p8, %p840_p7 }
  0x4e   :  { %663 = vmatpush3.bf16.msra.mxu0 %v746_v44  ;;  %p843_p10 = pnand %p842_p9, %p836_p6 }
  0x4f   :  { %373 = vmatpush1.bf16.msra.mxu1 %v711_v18  ;;  %664 = vmatprep.subr.bf16.mxu0 %v747_v45 }
  0x50   :  { %374 = vmatprep.subr.bf16.mxu1 %v712_v19 }
  0x52   :  { %665 = vmatpush3.bf16.msra.mxu0 %v748_v46 }
  0x53   :  { %375 = vmatpush1.bf16.msra.mxu1 %v714_v20  ;;  %666 = vmatprep.subr.bf16.mxu0 %v749_v47  ;;  %v639_v20 = vld [vmem:[%s943_s6] ss:$0 sm:$0xff] }
  0x54   :  { %376 = vmatprep.subr.bf16.mxu1 %v715_v21 }
  0x56   :  { %667 = vmatpush3.bf16.msra.mxu0 %v750_v48 }
  0x57   :  { %377 = vmatpush2.bf16.msra.mxu1 %v717_v22  ;;  %668 = vmatprep.subr.bf16.mxu0 %v751_v2 }
  0x58   :  { %378 = vmatprep.subr.bf16.mxu1 %v718_v23 }
  0x5a   :  { %669 = vmatpush3.bf16.msra.mxu0 %v752_v3 }
  0x5b   :  { %379 = vmatpush2.bf16.msra.mxu1 %v720_v24  ;;  %670 = vmatprep.subr.bf16.mxu0 %v753_v4  ;;  %v581_v24 = vand.u32 127, %v87_v49 }
  0x5c   :  { %380 = vmatprep.subr.bf16.mxu1 %v721_v25 }
  0x5d   :  { %vm584_vm1 = vcmp.lt.s32.totalorder %v581_v24, 2 }
  0x5e   :  { %671 = vmatpush3.bf16.msra.mxu0 %v754_v5 }
  0x5f   :  { %381 = vmatpush2.bf16.msra.mxu1 %v723_v26 }
  0x60   :  { %382 = vmatprep.subr.bf16.mxu1 %v724_v27 }
  0x63   :  { %383 = vmatpush2.bf16.msra.mxu1 %v726_v28 }
  0x64   :  { %384 = vmatprep.subr.bf16.mxu1 %v727_v29 }
  0x67   :  { %385 = vmatpush2.bf16.msra.mxu1 %v729_v30 }
  0x68   :  { %386 = vmatprep.subr.bf16.mxu1 %v730_v31 }
  0x6b   :  { %387 = vmatpush2.bf16.msra.mxu1 %v732_v32 }
  0x6c   :  { %388 = vmatprep.subr.bf16.mxu1 %v733_v33 }
  0x6f   :  { %389 = vmatpush2.bf16.msra.mxu1 %v735_v34 }
  0x70   :  { %390 = vmatprep.subr.bf16.mxu1 %v736_v35 }
  0x73   :  { %391 = vmatpush2.bf16.msra.mxu1 %v738_v36 }
  0xf9   :  { %v145_v56 = vpop.f32.mrf.mxu0 }
  0xfa   :  { %v146_v57 = vadd.f32 %v145_v56, %v90_v54 }
  0xfb   :  { %v147_v58 = vpop.f32.mrf.mxu0 }
  0xfc   :  { %v148_v59 = vadd.f32 %v147_v58, %v94_v55  ;;  %v152_v60 = vmax.f32 %v146_v57, 0.0 }
  0xfd   :  { %v149_v61 = vpop.f32.mrf.mxu0 }
  0xfe   :  { %v153_v62 = vmax.f32 %v148_v59, 0.0  ;;  %v154_v1 = vpack.c.bf16 %v152_v60, %v152_v60 }
  0xff   :  { %v150_v63 = vpop.f32.mrf.mxu0 }
 0x100   :  { %v155_v0 = vpack.c.bf16 %v153_v62, %v153_v62 }
 0x102   :  { %392 = vmatprep.mubr.bf16.mxu1 %v155_v0 }
 0x103   :  { %393 = vmatmul.mubr.bf16.vlgmr.msra.gmra.mxu1 %v154_v1 }
 0x1c3   :  { %v394_v9 = vpop.f32.mrf.mxu1 }
 0x1c4   :  { %v395_v10 = vadd.f32 %v394_v9, %v193_v7 }
 0x1c5   :  { %v396_v11 = vpop.f32.mrf.mxu1 }
 0x1c6   :  { %v397_v12 = vadd.f32 %v396_v11, %v197_v8  ;;  %v401_v13 = vmax.f32 %v395_v10, 0.0 }
 0x1c7   :  { %v398_v14 = vpop.f32.mrf.mxu1 }
 0x1c8   :  { %v402_v15 = vmax.f32 %v397_v12, 0.0  ;;  %v403_v18 = vpack.c.bf16 %v401_v13, %v401_v13 }
 0x1c9   :  { %v399_v16 = vpop.f32.mrf.mxu1 }
 0x1ca   :  { %v404_v17 = vpack.c.bf16 %v402_v15, %v402_v15 }
 0x1cc   :  { %572 = vmatprep.mubr.bf16.mxu0 %v404_v17 }
 0x1cd   :  { %573 = vmatmul.mubr.bf16.vlgmr.msra.gmra.mxu0 %v403_v18 }
 0x28d   :  { %v672_v19 = vpop.f32.mrf.mxu0 }
 0x28f   :  { %v673_v21 = vpop.f32.mrf.mxu0 }
 0x290   :  { %v674_v22 = vadd.f32 %v673_v21, %v672_v19 }
 0x291   :  { %v675_v23 = vpop.f32.mrf.mxu0 }
 0x292   :  { %v575_v25 = vadd.f32 %v674_v22, %v639_v20 }
 0x293   :  { %v676_v26 = vpop.f32.mrf.mxu0 }
 0x294   :  { %v582_v27 = vmax.f32 %v575_v25, 1e-06 }
 0x296   :  { %v583_v28 = vmin.f32 %v582_v27, 1.0 }
 0x298   :  { %v585_v29 = vsel %vm584_vm1, %v575_v25, %v583_v28 }
 0x299   :  { %586 = vst [vmem:[#allocation10] sm:$0xff] %v585_v29 }
 0x29a   :  { %846 = shalt.err (!%p843_p10)
}
 0x29b   :  { %596 = dma.vmem_to_hbm [thread:$0]  %s594_s26, 128, %s944_s7, [#allocation4]  }
 0x29c   :  { %861 = dma.done.wait [#allocation4], 128  }
 0x29d   :  { %862 = vsyncadd [#allocation4], 4294967168 }
 0x29e   :  { %600 = vsyncpa [#allocation3], 1 }
 0x29f   :  { %601 = vsyncpa [#allocation6], 1 }
 0x2a0   :  { %602 = vsyncpa [#allocation9], 1 }
 0x2a1   :  { %603 = vsyncpa [#allocation4], 1 }

</bundles_post_ra>
